<compile_context>
chip_gen: v7x
topology: tpu7x:2x2x1
jax: 0.10.0
libtpu: 0.0.40
codegen_flags: <defaults>
</compile_context>

<pallas_src>
import jax
import jax.numpy as jnp
from jax.experimental import pallas as pl
from jax.experimental.pallas import tpu as pltpu

_LANE = 128   # pad every feature dim to a multiple of the lane width
_TILE = 256   # row / reduction tile over the (padded) node axis


def _round_up(x, m):
    return ((x + m - 1) // m) * m


# --------------------------------------------------------------------------
# Kernel: one SAGEConv layer, tiled over (row block i, reduction block k).
#   acc   <- sum_k A[i, k] @ X[k]              (mean aggregation, f32 acc)
#   out_i <- concat([acc, X[i]]) @ W_fused + b (fused lin_l / lin_r GEMM)
#   layer 1 additionally applies ReLU and a 0/1 dropout mask.
# --------------------------------------------------------------------------
def _sage_body(a_ref, xk_ref, xr_ref, mask_ref, w_ref, b_ref, out_ref, acc_ref):
    k = pl.program_id(1)

    @pl.when(k == 0)
    def _init():
        acc_ref[...] = jnp.zeros_like(acc_ref)

    # bf16 A tile x bf16 X tile on the MXU, accumulate in f32.
    acc_ref[...] += jnp.dot(a_ref[...], xk_ref[...],
                            preferred_element_type=jnp.float32)

    @pl.when(k == pl.num_programs(1) - 1)
    def _finalize():
        agg = acc_ref[...]                              # (tm, Fpad) f32
        root = xr_ref[...].astype(jnp.float32)          # (tm, Fpad) f32
        feat = jnp.concatenate([agg, root], axis=-1)    # (tm, 2*Fpad)
        h = jnp.dot(feat, w_ref[...],
                    preferred_element_type=jnp.float32) + b_ref[...]
        if mask_ref is not None:                        # layer 1 only
            h = jnp.maximum(h, 0.0) * mask_ref[...].astype(jnp.float32)
        out_ref[...] = h.astype(out_ref.dtype)


def _sage_kernel_dropout(a_ref, xk_ref, xr_ref, mask_ref, w_ref, b_ref,
                         out_ref, acc_ref):
    _sage_body(a_ref, xk_ref, xr_ref, mask_ref, w_ref, b_ref, out_ref, acc_ref)


def _sage_kernel_plain(a_ref, xk_ref, xr_ref, w_ref, b_ref, out_ref, acc_ref):
    _sage_body(a_ref, xk_ref, xr_ref, None, w_ref, b_ref, out_ref, acc_ref)


def sage_layer(adj, x, w_fused, b, mask=None, *, out_dtype,
               tm=_TILE, tk=_TILE):
    """One tiled SAGEConv layer. adj:(Np,Np) bf16, x:(Np,Fp) bf16,
    w_fused:(2*Fp,Op) f32, b:(1,Op) f32, mask:(Np,Op) bf16 or None."""
    n_pad = adj.shape[0]
    f_pad = x.shape[1]
    o_pad = w_fused.shape[1]
    grid = (n_pad // tm, n_pad // tk)

    in_specs = [
        pl.BlockSpec((tm, tk), lambda i, k: (i, k)),      # A tile
        pl.BlockSpec((tk, f_pad), lambda i, k: (k, 0)),   # neighbor features
        pl.BlockSpec((tm, f_pad), lambda i, k: (i, 0)),   # root features
    ]
    args = [adj, x, x]
    if mask is not None:
        in_specs.append(pl.BlockSpec((tm, o_pad), lambda i, k: (i, 0)))
        args.append(mask)
        kernel = _sage_kernel_dropout
    else:
        kernel = _sage_kernel_plain
    in_specs += [
        pl.BlockSpec((2 * f_pad, o_pad), lambda i, k: (0, 0)),  # fused weights
        pl.BlockSpec((1, o_pad), lambda i, k: (0, 0)),          # bias
    ]
    args += [w_fused, b]

    flops = 2 * n_pad * n_pad * f_pad + 2 * n_pad * (2 * f_pad) * o_pad
    bytes_accessed = (adj.size * adj.dtype.itemsize
                      + 2 * x.size * x.dtype.itemsize
                      + w_fused.size * w_fused.dtype.itemsize
                      + n_pad * o_pad * jnp.dtype(out_dtype).itemsize)

    compiler_params = None
    if jax.default_backend() == "tpu":
        compiler_params = pltpu.CompilerParams(
            dimension_semantics=("parallel", "arbitrary"))

    return pl.pallas_call(
        kernel,
        out_shape=jax.ShapeDtypeStruct((n_pad, o_pad), out_dtype),
        grid=grid,
        in_specs=in_specs,
        out_specs=pl.BlockSpec((tm, o_pad), lambda i, k: (i, 0)),
        scratch_shapes=[pltpu.VMEM((tm, f_pad), jnp.float32)],
        compiler_params=compiler_params,
        cost_estimate=pl.CostEstimate(flops=flops, transcendentals=0,
                                      bytes_accessed=bytes_accessed),
    )(*args)


# --------------------------------------------------------------------------
# Plain-JAX glue: dense mean-aggregation adjacency, padded + cast to bf16.
# TODO(synk): for genuinely sparse graphs replace this with a scalar-prefetched
# CSR gather-aggregate kernel instead of a dense N x N matmul.
# --------------------------------------------------------------------------
def build_mean_adj(edge_index, num_nodes, n_pad):
    src = edge_index[0]
    dst = edge_index[1]
    a = jnp.zeros((num_nodes, num_nodes), jnp.float32).at[dst, src].add(1.0)
    deg = a.sum(axis=1, keepdims=True)
    a = a / jnp.maximum(deg, 1.0)
    a_pad = jnp.zeros((n_pad, n_pad), jnp.float32).at[:num_nodes,
                                                      :num_nodes].set(a)
    return a_pad.astype(jnp.bfloat16)


class Graph:
    """JAX/Pallas port of the PyTorch `Graph` module (training-mode forward)."""

    def __init__(self, x, edge_index, output_size=8, key=None, dropout_p=0.5):
        n_nodes, input_size = x.shape
        hidden = input_size // 2
        self.n_nodes = n_nodes
        self.output_size = output_size
        self.dropout_p = dropout_p

        self.n_pad = _round_up(n_nodes, _TILE)
        self.f_pad = _round_up(input_size, _LANE)
        self.h_pad = _round_up(hidden, _LANE)
        self.o_pad = _round_up(output_size, _LANE)

        key = jax.random.PRNGKey(42) if key is None else key
        ks = jax.random.split(key, 4)

        def glorot(k, shape):
            limit = (6.0 / (shape[0] + shape[1])) ** 0.5
            return jax.random.uniform(k, shape, jnp.float32, -limit, limit)

        def pad2(w, rows, cols):
            return jnp.zeros((rows, cols), jnp.float32).at[
                :w.shape[0], :w.shape[1]].set(w)

        # SAGEConv params: lin_l (with bias) on the aggregated neighbors,
        # lin_r (no bias) on the root features — matching PyG SAGEConv('mean').
        w1l = glorot(ks[0], (input_size, hidden))
        w1r = glorot(ks[1], (input_size, hidden))
        w2l = glorot(ks[2], (hidden, output_size))
        w2r = glorot(ks[3], (hidden, output_size))

        keep = 1.0 - dropout_p
        # Fused [lin_l ; lin_r] weights, zero-padded to lane width.  The
        # dropout 1/keep scale is folded into the layer-2 weights.
        self.w1 = jnp.concatenate(
            [pad2(w1l, self.f_pad, self.h_pad),
             pad2(w1r, self.f_pad, self.h_pad)], axis=0)
        self.b1 = jnp.zeros((1, self.h_pad), jnp.float32)
        self.w2 = jnp.concatenate(
            [pad2(w2l / keep, self.h_pad, self.o_pad),
             pad2(w2r / keep, self.h_pad, self.o_pad)], axis=0)
        self.b2 = jnp.zeros((1, self.o_pad), jnp.float32)

        self.adj = build_mean_adj(edge_index, n_nodes, self.n_pad)
        self.x_pad = jnp.zeros((self.n_pad, self.f_pad), jnp.bfloat16).at[
            :n_nodes, :input_size].set(x.astype(jnp.bfloat16))

        self.embeddings = jnp.zeros((n_nodes, output_size), jnp.float32)
        self.training = True

    def forward(self, idx, dropout_key=None):
        if self.training:
            dk = jax.random.PRNGKey(0) if dropout_key is None else dropout_key
            mask = jax.random.bernoulli(
                dk, 1.0 - self.dropout_p,
                (self.n_pad, self.h_pad)).astype(jnp.bfloat16)
            # Layer 1: SAGEConv -> ReLU -> dropout mask (h kept in bf16).
            h = sage_layer(self.adj, self.x_pad, self.w1, self.b1, mask=mask,
                           out_dtype=jnp.bfloat16)
            # Layer 2: SAGEConv (dropout scale folded into w2).
            emb = sage_layer(self.adj, h, self.w2, self.b2, mask=None,
                             out_dtype=jnp.float32)
            self.embeddings = emb[:self.n_nodes, :self.output_size]
        return self.embeddings[idx]


if __name__ == "__main__":
    key = jax.random.PRNGKey(0)
    k_feat, k_edge, k_param, k_drop = jax.random.split(key, 4)

    # Small synthetic graph: 16 nodes, 16 features each, 40 random edges.
    n_nodes, input_size, n_edges, output_size = 16, 16, 40, 8
    x_nodes = jax.random.normal(k_feat, (n_nodes, input_size), jnp.float32)
    edge_index = jax.random.randint(k_edge, (2, n_edges), 0, n_nodes, jnp.int32)

    model = Graph(x_nodes, edge_index, output_size=output_size, key=k_param)

    # forward(x): x is a batch of node indices; returns their embeddings.
    node_ids = jnp.array([0, 3, 7, 12], dtype=jnp.int32)
    out = model.forward(node_ids, dropout_key=k_drop)
    jax.block_until_ready(out)

    assert out.shape == (node_ids.shape[0], output_size)
    assert out.dtype == jnp.float32
    print("KERNEL_OK")
</pallas_src>

<mosaic_0001>
module attributes {stable_mosaic.version = 11 : i64} {
  func.func @_sage_kernel_dropout(%arg0: i32, %arg1: i32, %arg2: memref<256x256xbf16, #tpu.memory_space<vmem>>, %arg3: memref<256x128xbf16, #tpu.memory_space<vmem>>, %arg4: memref<256x128xbf16, #tpu.memory_space<vmem>>, %arg5: memref<256x128xbf16, #tpu.memory_space<vmem>>, %arg6: memref<256x128xf32, #tpu.memory_space<vmem>>, %arg7: memref<1x128xf32, #tpu.memory_space<vmem>>, %arg8: memref<256x128xbf16, #tpu.memory_space<vmem>>, %arg9: memref<256x128xf32, #tpu.memory_space<vmem>>) attributes {dimension_semantics = [#tpu.dimension_semantics<arbitrary>, #tpu.dimension_semantics<arbitrary>], iteration_bounds = array<i64: 1, 1>, scalar_prefetch = 0 : i64, scratch_operands = 1 : i64, tpu.core_type = #tpu.core_type<tc>, window_params = [{transform_indices = @transform_0, window_bounds = array<i64: 256, 256>}, {transform_indices = @transform_1, window_bounds = array<i64: 256, 128>}, {transform_indices = @transform_2, window_bounds = array<i64: 256, 128>}, {transform_indices = @transform_3, window_bounds = array<i64: 256, 128>}, {pipeline_mode = #tpu.pipeline_mode<synchronous>, transform_indices = @transform_4, window_bounds = array<i64: 256, 128>}, {pipeline_mode = #tpu.pipeline_mode<synchronous>, transform_indices = @transform_5, window_bounds = array<i64: 1, 128>}, {transform_indices = @transform_6, window_bounds = array<i64: 256, 128>}]} {
    %c0_i32 = arith.constant 0 : i32
    %0 = arith.cmpi eq, %arg1, %c0_i32 : i32
    %1 = arith.extui %0 : i1 to i32
    %c0_i32_0 = arith.constant 0 : i32
    %2 = arith.cmpi ne, %1, %c0_i32_0 : i32
    scf.if %2 {
      %cst_10 = arith.constant 0.000000e+00 : f32
      %12 = vector.broadcast %cst_10 : f32 to vector<256x128xf32>
      %c0_11 = arith.constant 0 : index
      %c0_12 = arith.constant 0 : index
      %13 = vector.load %arg9[%c0_11, %c0_12] : memref<256x128xf32, #tpu.memory_space<vmem>>, vector<256x128xf32>
      tpu.vector_store %arg9[%c0_11, %c0_12], %12 {strides = array<i32>} : memref<256x128xf32, #tpu.memory_space<vmem>>, vector<256x128xf32>,
    } else {
    }
    %c0 = arith.constant 0 : index
    %c0_1 = arith.constant 0 : index
    %3 = vector.load %arg9[%c0, %c0_1] : memref<256x128xf32, #tpu.memory_space<vmem>>, vector<256x128xf32>
    %c0_2 = arith.constant 0 : index
    %c0_3 = arith.constant 0 : index
    %4 = vector.load %arg2[%c0_2, %c0_3] : memref<256x256xbf16, #tpu.memory_space<vmem>>, vector<256x256xbf16>
    %c0_4 = arith.constant 0 : index
    %c0_5 = arith.constant 0 : index
    %5 = vector.load %arg3[%c0_4, %c0_5] : memref<256x128xbf16, #tpu.memory_space<vmem>>, vector<256x128xbf16>
    %cst = arith.constant dense<0.000000e+00> : vector<256x128xf32>
    %6 = tpu.matmul %4, %5, %cst {dimension_numbers = #tpu.dot_dimension_numbers<[1], [0], [0], [1], [0, 0, 1, 1], [], []>} : vector<256x256xbf16>, vector<256x128xbf16>, vector<256x128xf32> -> vector<256x128xf32>
    %7 = arith.addf %3, %6 : vector<256x128xf32>
    %c0_6 = arith.constant 0 : index
    %c0_7 = arith.constant 0 : index
    %8 = vector.load %arg9[%c0_6, %c0_7] : memref<256x128xf32, #tpu.memory_space<vmem>>, vector<256x128xf32>
    tpu.vector_store %arg9[%c0_6, %c0_7], %7 {strides = array<i32>} : memref<256x128xf32, #tpu.memory_space<vmem>>, vector<256x128xf32>,
    %c0_i32_8 = arith.constant 0 : i32
    %9 = arith.cmpi eq, %arg1, %c0_i32_8 : i32
    %10 = arith.extui %9 : i1 to i32
    %c0_i32_9 = arith.constant 0 : i32
    %11 = arith.cmpi ne, %10, %c0_i32_9 : i32
    scf.if %11 {
      %c0_10 = arith.constant 0 : index
      %c0_11 = arith.constant 0 : index
      %12 = vector.load %arg9[%c0_10, %c0_11] : memref<256x128xf32, #tpu.memory_space<vmem>>, vector<256x128xf32>
      %c0_12 = arith.constant 0 : index
      %c0_13 = arith.constant 0 : index
      %13 = vector.load %arg4[%c0_12, %c0_13] : memref<256x128xbf16, #tpu.memory_space<vmem>>, vector<256x128xbf16>
      %14 = arith.extf %13 : vector<256x128xbf16> to vector<256x128xf32>
      %15 = tpu.concatenate %12, %14 in 1 : vector<256x128xf32>, vector<256x128xf32> -> vector<256x256xf32>
      %c0_14 = arith.constant 0 : index
      %c0_15 = arith.constant 0 : index
      %16 = vector.load %arg6[%c0_14, %c0_15] : memref<256x128xf32, #tpu.memory_space<vmem>>, vector<256x128xf32>
      %cst_16 = arith.constant dense<0.000000e+00> : vector<256x128xf32>
      %17 = tpu.matmul %15, %16, %cst_16 {dimension_numbers = #tpu.dot_dimension_numbers<[1], [0], [0], [1], [0, 0, 1, 1], [], []>} : vector<256x256xf32>, vector<256x128xf32>, vector<256x128xf32> -> vector<256x128xf32>
      %c0_17 = arith.constant 0 : index
      %c0_18 = arith.constant 0 : index
      %18 = vector.load %arg7[%c0_17, %c0_18] : memref<1x128xf32, #tpu.memory_space<vmem>>, vector<1x128xf32>
      %19 = vector.broadcast %18 : vector<1x128xf32> to vector<256x128xf32>
      %20 = arith.addf %17, %19 : vector<256x128xf32>
      %cst_19 = arith.constant 0.000000e+00 : f32
      %21 = vector.broadcast %cst_19 : f32 to vector<256x128xf32>
      %22 = arith.maximumf %20, %21 : vector<256x128xf32>
      %c0_20 = arith.constant 0 : index
      %c0_21 = arith.constant 0 : index
      %23 = vector.load %arg5[%c0_20, %c0_21] : memref<256x128xbf16, #tpu.memory_space<vmem>>, vector<256x128xbf16>
      %24 = arith.extf %23 : vector<256x128xbf16> to vector<256x128xf32>
      %25 = arith.mulf %22, %24 : vector<256x128xf32>
      %26 = arith.truncf %25 : vector<256x128xf32> to vector<256x128xbf16>
      %c0_22 = arith.constant 0 : index
      %c0_23 = arith.constant 0 : index
      %27 = vector.load %arg8[%c0_22, %c0_23] : memref<256x128xbf16, #tpu.memory_space<vmem>>, vector<256x128xbf16>
      tpu.vector_store %arg8[%c0_22, %c0_23], %26 {strides = array<i32>} : memref<256x128xbf16, #tpu.memory_space<vmem>>, vector<256x128xbf16>,
    } else {
    }
    return
  }
  func.func @transform_0(%arg0: i32, %arg1: i32) -> (i32, i32) {
    %c0_i32 = arith.constant 0 : i32
    return %arg0, %arg1 : i32, i32
  }
  func.func @transform_1(%arg0: i32, %arg1: i32) -> (i32, i32) {
    %c0_i32 = arith.constant 0 : i32
    %c0_i32_0 = arith.constant 0 : i32
    return %arg1, %c0_i32 : i32, i32
  }
  func.func @transform_2(%arg0: i32, %arg1: i32) -> (i32, i32) {
    %c0_i32 = arith.constant 0 : i32
    %c0_i32_0 = arith.constant 0 : i32
    return %arg0, %c0_i32 : i32, i32
  }
  func.func @transform_3(%arg0: i32, %arg1: i32) -> (i32, i32) {
    %c0_i32 = arith.constant 0 : i32
    %c0_i32_0 = arith.constant 0 : i32
    return %arg0, %c0_i32 : i32, i32
  }
  func.func @transform_4(%arg0: i32, %arg1: i32) -> (i32, i32) {
    %c0_i32 = arith.constant 0 : i32
    %c0_i32_0 = arith.constant 0 : i32
    %c0_i32_1 = arith.constant 0 : i32
    return %c0_i32, %c0_i32_0 : i32, i32
  }
  func.func @transform_5(%arg0: i32, %arg1: i32) -> (i32, i32) {
    %c0_i32 = arith.constant 0 : i32
    %c0_i32_0 = arith.constant 0 : i32
    %c0_i32_1 = arith.constant 0 : i32
    return %c0_i32, %c0_i32_0 : i32, i32
  }
  func.func @transform_6(%arg0: i32, %arg1: i32) -> (i32, i32) {
    %c0_i32 = arith.constant 0 : i32
    %c0_i32_0 = arith.constant 0 : i32
    return %arg0, %c0_i32 : i32, i32
  }
}

</mosaic_0001>

<bundles_post_ra>
// kernel: tpu_custom_call.1
= control target key start
LH: loop header
LB: loop body
LE: loop exit
PB: predicated region body
PF: predicated region fallthrough
CT: control target
= control target key end

     0   :  { %11 = vsyncpa [#allocation4], 0  ;;  %s2354_s0 = inlined_call_operand.hbm [shape: bf16[256,256], index: 0, kind: input, shape index: {}]   ;;  %s2355_s1 = inlined_call_operand.hbm [shape: bf16[256,128], index: 1, kind: input, shape index: {}]   ;;  %s2356_s2 = inlined_call_operand.hbm [shape: bf16[256,128], index: 2, kind: input, shape index: {}]   ;;  %s2357_s3 = inlined_call_operand.hbm [shape: bf16[256,128], index: 3, kind: input, shape index: {}]   ;;  %s2358_s4 = inlined_call_operand.hbm [shape: f32[256,128], index: 4, kind: input, shape index: {}]   ;;  %s2359_s5 = inlined_call_operand.vmem [shape: f32[1,128], index: 5, kind: input, shape index: {}]   ;;  %s2360_s6 = inlined_call_operand.hbm [shape: bf16[256,128], index: 6, kind: output, shape index: {}]  }
   0x1   :  { %12 = vsyncpa [#allocation7], 0 }
   0x2   :  { %13 = vsyncpa [#allocation10], 0 }
   0x3   :  { %14 = vsyncpa [#allocation5], 0  ;;  %s2149_s21 = smov [#allocation6]   ;;  %s2009_s25 = scalar_lea.hbm %s2355_s1, 2048 }
   0x4   :  { %s32_s22 = sshll.u32 %s2149_s21, 4  ;;  %p2010_p0 = scmp.ne.s32.totalorder %s2355_s1, %s2009_s25  ;;  %s33_s22 = int_to_ptr.vmem [resolvable:$true] %s32_s22 }
   0x5   :  { %p2013_p1 = scmp.lt.u32.totalorder %s2009_s25, %s2355_s1 }
   0x7   :  { %p2015_p2 = pnand %p2013_p1, %p2010_p0 }
   0x9   :  { %2018 = shalt.err (!%p2015_p2)
}
   0xa   :  { %s2019_s30 = scalar_lea.vmem %s33_s22, 2048  ;;  %p2024_p4 = scmp.lt.s32.totalorder %s33_s22, %s33_s22 }
   0xb   :  { %p2020_p3 = scmp.ne.s32.totalorder %s33_s22, %s2019_s30  ;;  %p2025_p5 = scmp.lt.s32.totalorder %s2019_s30, %s2019_s30 }
   0xd   :  { %p2026_p6 = por %p2025_p5, %p2024_p4 }
   0xf   :  { %p2027_p7 = pnand %p2026_p6, %p2020_p3 }
  0x11   :  { %2030 = shalt.err (!%p2027_p7)
}
  0x12   :  { %s2150_s7 = smov 64   ;;  %s2151_s8 = smov 4  }
  0x13   :  { %38 = dma.hbm_to_vmem [thread:$0]  %s2355_s1, 2048, %s33_s22, [#allocation7], %s2150_s7, %s2150_s7, %s2151_s8  }
  0x14   :  { %s2152_s11 = smov [#allocation9]   ;;  %s2153_s13 = smov [#allocation3]  }
  0x15   :  { %s56_s12 = sshll.u32 %s2152_s11, 4  ;;  %s20_s14 = sshll.u32 %s2153_s13, 4  ;;  %s57_s12 = int_to_ptr.vmem [resolvable:$true] %s56_s12  ;;  %s21_s14 = int_to_ptr.vmem [resolvable:$true] %s20_s14 }
  0x16   :  { %s2031_s17 = scalar_lea.hbm %s2357_s3, 2048 }
  0x17   :  { %p2032_p8 = scmp.ne.s32.totalorder %s2357_s3, %s2031_s17  ;;  %p2035_p9 = scmp.lt.u32.totalorder %s2031_s17, %s2357_s3 }
  0x19   :  { %p2037_p10 = pnand %p2035_p9, %p2032_p8 }
  0x1b   :  { %2040 = shalt.err (!%p2037_p10)
}
  0x1c   :  { %s2041_s1 = scalar_lea.vmem %s57_s12, 2048  ;;  %p2046_p12 = scmp.lt.s32.totalorder %s57_s12, %s57_s12 }
  0x1d   :  { %p2042_p11 = scmp.ne.s32.totalorder %s57_s12, %s2041_s1  ;;  %p2047_p13 = scmp.lt.s32.totalorder %s2041_s1, %s2041_s1 }
  0x1f   :  { %p2048_p0 = por %p2047_p13, %p2046_p12 }
  0x21   :  { %p2049_p1 = pnand %p2048_p0, %p2042_p11 }
  0x23   :  { %2052 = shalt.err (!%p2049_p1)
}
  0x24   :  { %62 = dma.hbm_to_vmem [thread:$0]  %s2357_s3, 2048, %s57_s12, [#allocation10], %s2150_s7, %s2150_s7, %s2151_s8  }
  0x25   :  { %s2053_s26 = scalar_lea.hbm %s2354_s0, 4096 }
  0x26   :  { %p2054_p2 = scmp.ne.s32.totalorder %s2354_s0, %s2053_s26  ;;  %p2057_p3 = scmp.lt.u32.totalorder %s2053_s26, %s2354_s0 }
  0x28   :  { %p2059_p4 = pnand %p2057_p3, %p2054_p2 }
  0x2a   :  { %2062 = shalt.err (!%p2059_p4)
}
  0x2b   :  { %s2063_s9 = scalar_lea.vmem %s21_s14, 4096  ;;  %p2068_p6 = scmp.lt.s32.totalorder %s21_s14, %s21_s14 }
  0x2c   :  { %p2064_p5 = scmp.ne.s32.totalorder %s21_s14, %s2063_s9  ;;  %p2069_p7 = scmp.lt.s32.totalorder %s2063_s9, %s2063_s9 }
  0x2e   :  { %p2070_p8 = por %p2069_p7, %p2068_p6 }
  0x30   :  { %p2071_p9 = pnand %p2070_p8, %p2064_p5 }
  0x32   :  { %2074 = shalt.err (!%p2071_p9)
}
  0x33   :  { %s2154_s3 = smov 128   ;;  %s2155_s10 = smov 8  }
  0x34   :  { %26 = dma.hbm_to_vmem [thread:$0]  %s2354_s0, 4096, %s21_s14, [#allocation4], %s2154_s3, %s2154_s3, %s2155_s10  }
  0x35   :  { %s2156_s13 = smov [#allocation8]   ;;  %s2157_s16 = smov [#allocation11]  }
  0x36   :  { %s44_s15 = sshll.u32 %s2156_s13, 4  ;;  %s68_s17 = sshll.u32 %s2157_s16, 4  ;;  %s45_s15 = int_to_ptr.vmem [resolvable:$true] %s44_s15  ;;  %s69_s17 = int_to_ptr.vmem [resolvable:$true] %s68_s17 }
  0x37   :  { %s2075_s20 = scalar_lea.hbm %s2356_s2, 2048 }
  0x38   :  { %p2076_p10 = scmp.ne.s32.totalorder %s2356_s2, %s2075_s20  ;;  %p2079_p11 = scmp.lt.u32.totalorder %s2075_s20, %s2356_s2 }
  0x3a   :  { %p2081_p12 = pnand %p2079_p11, %p2076_p10 }
  0x3c   :  { %2084 = shalt.err (!%p2081_p12)
}
  0x3d   :  { %s2085_s0 = scalar_lea.vmem %s45_s15, 2048  ;;  %p2090_p0 = scmp.lt.s32.totalorder %s45_s15, %s45_s15 }
  0x3e   :  { %p2086_p13 = scmp.ne.s32.totalorder %s45_s15, %s2085_s0  ;;  %p2091_p1 = scmp.lt.s32.totalorder %s2085_s0, %s2085_s0 }
  0x40   :  { %p2092_p2 = por %p2091_p1, %p2090_p0 }
  0x42   :  { %p2093_p3 = pnand %p2092_p2, %p2086_p13 }
  0x44   :  { %2096 = shalt.err (!%p2093_p3)
}
  0x45   :  { %50 = dma.hbm_to_vmem [thread:$0]  %s2356_s2, 2048, %s45_s15, [#allocation7], %s2150_s7, %s2150_s7, %s2151_s8  }
  0x46   :  { %s2097_s27 = scalar_lea.hbm %s2358_s4, 4096 }
  0x47   :  { %p2098_p4 = scmp.ne.s32.totalorder %s2358_s4, %s2097_s27  ;;  %p2101_p5 = scmp.lt.u32.totalorder %s2097_s27, %s2358_s4 }
  0x49   :  { %p2103_p6 = pnand %p2101_p5, %p2098_p4 }
  0x4b   :  { %2106 = shalt.err (!%p2103_p6)
}
  0x4c   :  { %s2107_s11 = scalar_lea.vmem %s69_s17, 4096  ;;  %p2112_p8 = scmp.lt.s32.totalorder %s69_s17, %s69_s17 }
  0x4d   :  { %p2108_p7 = scmp.ne.s32.totalorder %s69_s17, %s2107_s11  ;;  %p2113_p9 = scmp.lt.s32.totalorder %s2107_s11, %s2107_s11 }
  0x4f   :  { %p2114_p10 = por %p2113_p9, %p2112_p8 }
  0x51   :  { %p2115_p11 = pnand %p2114_p10, %p2108_p7 }
  0x53   :  { %2118 = shalt.err (!%p2115_p11)
}
  0x54   :  { %74 = dma.hbm_to_vmem [thread:$0]  %s2358_s4, 4096, %s69_s17, [#allocation10], %s2154_s3, %s2154_s3, %s2155_s10  }
  0x55   :  { %2141 = dma.done.wait [#allocation4], 4096  }
  0x56   :  { %2142 = vsyncadd [#allocation4], 4294963200 }
  0x57   :  { %2143 = dma.done.wait [#allocation7], 4096  }
  0x58   :  { %2144 = vsyncadd [#allocation7], 4294963200 }
  0x59   :  { %2145 = dma.done.wait [#allocation10], 6144  }
  0x5a   :  { %2146 = vsyncadd [#allocation10], 4294961152  ;;  %v1945_v0 = vld [vmem:[#allocation6 + $0x40] sm:$0xff]   ;;  %v1947_v2 = vld [vmem:[#allocation6 + $0x48] sm:$0xff]   ;;  %v2158_v17 = vmov 0.0|0.0  }
  0x5b   :  { %v1946_v1 = vld [vmem:[#allocation6] sm:$0xff]   ;;  %1742 = vmatprep.subr.bf16.mxu0 %v1945_v0  ;;  %v1948_v3 = vld [vmem:[#allocation6 + $0x8] sm:$0xff]   ;;  %v1949_v4 = vld [vmem:[#allocation6 + $0x50] sm:$0xff]   ;;  %1902 = vmatprep.subr.bf16.mxu1 %v2158_v17 }
  0x5c   :  { %1743 = vmatpush3.bf16.msra.mxu0 %v1946_v1  ;;  %v1950_v5 = vld [vmem:[#allocation6 + $0x10] sm:$0xff]   ;;  %v1951_v6 = vld [vmem:[#allocation6 + $0x58] sm:$0xff]   ;;  %v1953_v8 = vld [vmem:[#allocation6 + $0x60] sm:$0xff]  }
  0x5d   :  { %1744 = vmatprep.subr.bf16.mxu0 %v1947_v2  ;;  %v1952_v7 = vld [vmem:[#allocation6 + $0x18] sm:$0xff]   ;;  %v1954_v9 = vld [vmem:[#allocation6 + $0x20] sm:$0xff]   ;;  %v1955_v10 = vld [vmem:[#allocation6 + $0x68] sm:$0xff]  }
  0x5e   :  { %v1963_v11 = vld [vmem:[#allocation3 + $0x4] ss:$8 sps:$4 sm:$0xff]   ;;  %v1957_v13 = vld [vmem:[#allocation6 + $0x70] sm:$0xff]   ;;  %v1959_v15 = vld [vmem:[#allocation6 + $0x78] sm:$0xff]  }
  0x5f   :  { %v1956_v12 = vld [vmem:[#allocation6 + $0x28] sm:$0xff]   ;;  %513 = vmatprep.mubr.bf16.mxu0 %v1963_v11  ;;  %v1958_v14 = vld [vmem:[#allocation6 + $0x30] sm:$0xff]   ;;  %v1960_v16 = vld [vmem:[#allocation6 + $0x38] sm:$0xff]  }
  0x60   :  { %1745 = vmatpush3.bf16.msra.mxu0 %v1948_v3  ;;  %v1961_v18 = vld [vmem:[#allocation3] ss:$8 sps:$4 sm:$0xff]   ;;  %v1964_v19 = vld [vmem:[#allocation3 + $0x14] ss:$8 sps:$4 sm:$0xff]   ;;  %v1966_v22 = vld [vmem:[#allocation3 + $0x10] ss:$8 sps:$4 sm:$0xff]  }
  0x61   :  { %1746 = vmatprep.subr.bf16.mxu0 %v1949_v4  ;;  %v805_v20 = vld [vmem:[#allocation11] sm:$0xff]  ;;  %v806_v21 = vld [vmem:[#allocation11 + $0x8] sm:$0xff]  ;;  %v807_v24 = vld [vmem:[#allocation11 + $0x10] sm:$0xff] }
  0x62   :  { %v1855_v23 = vpack.c.bf16 %v806_v21, %v805_v20  ;;  %v808_v25 = vld [vmem:[#allocation11 + $0x18] sm:$0xff]  ;;  %v1967_v26 = vld [vmem:[#allocation3 + $0x24] ss:$8 sps:$4 sm:$0xff]   ;;  %v811_v31 = vld [vmem:[#allocation11 + $0x30] sm:$0xff] }
  0x63   :  { %v1858_v27 = vpack.c.bf16 %v808_v25, %v807_v24  ;;  %v809_v28 = vld [vmem:[#allocation11 + $0x20] sm:$0xff]  ;;  %v810_v29 = vld [vmem:[#allocation11 + $0x28] sm:$0xff]  ;;  %v812_v32 = vld [vmem:[#allocation11 + $0x38] sm:$0xff] }
  0x64   :  { %1747 = vmatpush3.bf16.msra.mxu0 %v1950_v5  ;;  %1918 = vmatpush1.bf16.msra.mxu1 %v1855_v23  ;;  %v1861_v30 = vpack.c.bf16 %v810_v29, %v809_v28  ;;  %v1969_v33 = vld [vmem:[#allocation3 + $0x20] ss:$8 sps:$4 sm:$0xff]   ;;  %v1970_v34 = vld [vmem:[#allocation3 + $0x34] ss:$8 sps:$4 sm:$0xff]   ;;  %v1864_v35 = vpack.c.bf16 %v812_v32, %v811_v31  ;;  %v1972_v41 = vld [vmem:[#allocation3 + $0x30] ss:$8 sps:$4 sm:$0xff]  }
  0x65   :  { %1748 = vmatprep.subr.bf16.mxu0 %v1951_v6  ;;  %1903 = vmatprep.subr.bf16.mxu1 %v2158_v17  ;;  %v813_v36 = vld [vmem:[#allocation11 + $0x40] sm:$0xff]  ;;  %v814_v37 = vld [vmem:[#allocation11 + $0x48] sm:$0xff]  ;;  %v815_v39 = vld [vmem:[#allocation11 + $0x50] sm:$0xff] }
  0x66   :  { %v1867_v38 = vpack.c.bf16 %v814_v37, %v813_v36  ;;  %v816_v40 = vld [vmem:[#allocation11 + $0x58] sm:$0xff]  ;;  %v1973_v42 = vld [vmem:[#allocation3 + $0x44] ss:$8 sps:$4 sm:$0xff]   ;;  %v819_v47 = vld [vmem:[#allocation11 + $0x70] sm:$0xff] }
  0x67   :  { %v1870_v43 = vpack.c.bf16 %v816_v40, %v815_v39  ;;  %v817_v44 = vld [vmem:[#allocation11 + $0x60] sm:$0xff]  ;;  %v818_v45 = vld [vmem:[#allocation11 + $0x68] sm:$0xff]  ;;  %v820_v48 = vld [vmem:[#allocation11 + $0x78] sm:$0xff] }
  0x68   :  { %1749 = vmatpush3.bf16.msra.mxu0 %v1952_v7  ;;  %1919 = vmatpush1.bf16.msra.mxu1 %v1858_v27  ;;  %v1873_v46 = vpack.c.bf16 %v818_v45, %v817_v44  ;;  %v1975_v49 = vld [vmem:[#allocation3 + $0x40] ss:$8 sps:$4 sm:$0xff]   ;;  %v1976_v50 = vld [vmem:[#allocation3 + $0x54] ss:$8 sps:$4 sm:$0xff]   ;;  %v1876_v51 = vpack.c.bf16 %v820_v48, %v819_v47  ;;  %v1978_v57 = vld [vmem:[#allocation3 + $0x50] ss:$8 sps:$4 sm:$0xff]  }
  0x69   :  { %1750 = vmatprep.subr.bf16.mxu0 %v1953_v8  ;;  %1904 = vmatprep.subr.bf16.mxu1 %v2158_v17  ;;  %v821_v52 = vld [vmem:[#allocation11 + $0x80] sm:$0xff]  ;;  %v822_v53 = vld [vmem:[#allocation11 + $0x88] sm:$0xff]  ;;  %v823_v55 = vld [vmem:[#allocation11 + $0x90] sm:$0xff] }
  0x6a   :  { %v1879_v54 = vpack.c.bf16 %v822_v53, %v821_v52  ;;  %v824_v56 = vld [vmem:[#allocation11 + $0x98] sm:$0xff]  ;;  %v1979_v58 = vld [vmem:[#allocation3 + $0x64] ss:$8 sps:$4 sm:$0xff]   ;;  %v827_v63 = vld [vmem:[#allocation11 + $0xb0] sm:$0xff] }
  0x6b   :  { %v1882_v59 = vpack.c.bf16 %v824_v56, %v823_v55  ;;  %v825_v60 = vld [vmem:[#allocation11 + $0xa0] sm:$0xff]  ;;  %v826_v61 = vld [vmem:[#allocation11 + $0xa8] sm:$0xff]  ;;  %v828_v0 = vld [vmem:[#allocation11 + $0xb8] sm:$0xff] }
  0x6c   :  { %1751 = vmatpush3.bf16.msra.mxu0 %v1954_v9  ;;  %1920 = vmatpush1.bf16.msra.mxu1 %v1861_v30  ;;  %v1885_v62 = vpack.c.bf16 %v826_v61, %v825_v60  ;;  %v1981_v1 = vld [vmem:[#allocation3 + $0x60] ss:$8 sps:$4 sm:$0xff]   ;;  %v1982_v2 = vld [vmem:[#allocation3 + $0x74] ss:$8 sps:$4 sm:$0xff]   ;;  %v1888_v3 = vpack.c.bf16 %v828_v0, %v827_v63  ;;  %v1984_v9 = vld [vmem:[#allocation3 + $0x70] ss:$8 sps:$4 sm:$0xff]  }
  0x6d   :  { %1752 = vmatprep.subr.bf16.mxu0 %v1955_v10  ;;  %1905 = vmatprep.subr.bf16.mxu1 %v2158_v17  ;;  %v829_v4 = vld [vmem:[#allocation11 + $0xc0] sm:$0xff]  ;;  %v830_v5 = vld [vmem:[#allocation11 + $0xc8] sm:$0xff]  ;;  %v831_v7 = vld [vmem:[#allocation11 + $0xd0] sm:$0xff] }
  0x6e   :  { %v1891_v6 = vpack.c.bf16 %v830_v5, %v829_v4  ;;  %v832_v8 = vld [vmem:[#allocation11 + $0xd8] sm:$0xff]  ;;  %v1985_v10 = vld [vmem:[#allocation3 + $0x84] ss:$8 sps:$4 sm:$0xff]   ;;  %v1993_v20 = vld [vmem:[#allocation3 + $0xa0] ss:$8 sps:$4 sm:$0xff]  }
  0x6f   :  { %v1894_v11 = vpack.c.bf16 %v832_v8, %v831_v7  ;;  %v1994_v21 = vld [vmem:[#allocation3 + $0xb4] ss:$8 sps:$4 sm:$0xff]   ;;  %v1996_v25 = vld [vmem:[#allocation3 + $0xb0] ss:$8 sps:$4 sm:$0xff]   ;;  %v2003_v31 = vld [vmem:[#allocation3 + $0xe4] ss:$8 sps:$4 sm:$0xff]  }
  0x70   :  { %1753 = vmatpush3.bf16.msra.mxu0 %v1956_v12  ;;  %1921 = vmatpush1.bf16.msra.mxu1 %v1864_v35  ;;  %v833_v12 = vld [vmem:[#allocation11 + $0xe0] sm:$0xff]  ;;  %v1698_v28 = vld [vmem:[#allocation8 + $0x10] sm:$0xff]  }
  0x71   :  { %1754 = vmatprep.subr.bf16.mxu0 %v1957_v13  ;;  %1906 = vmatprep.subr.bf16.mxu1 %v2158_v17  ;;  %v834_v13 = vld [vmem:[#allocation11 + $0xe8] sm:$0xff]  ;;  %v2002_v29 = vld [vmem:[#allocation3 + $0xd0] ss:$8 sps:$4 sm:$0xff]   ;;  %v1500_v55 = vunpack.c.h.bf16 %v1698_v28 }
  0x72   :  { %v2005_v32 = vld [vmem:[#allocation3 + $0xe0] ss:$8 sps:$4 sm:$0xff]  }
  0x74   :  { %1755 = vmatpush3.bf16.msra.mxu0 %v1958_v14  ;;  %1922 = vmatpush1.bf16.msra.mxu1 %v1867_v38  ;;  %v1897_v14 = vpack.c.bf16 %v834_v13, %v833_v12  ;;  %v1701_v12 = vld [vmem:[#allocation8 + $0x28] sm:$0xff]  }
  0x75   :  { %1756 = vmatprep.subr.bf16.mxu0 %v1959_v15  ;;  %1907 = vmatprep.subr.bf16.mxu1 %v2158_v17  ;;  %v1987_v15 = vld [vmem:[#allocation3 + $0x80] ss:$8 sps:$4 sm:$0xff]  }
  0x78   :  { %1757 = vmatpush3.bf16.msra.mxu0 %v1960_v16  ;;  %1923 = vmatpush1.bf16.msra.mxu1 %v1870_v43  ;;  %v1988_v16 = vld [vmem:[#allocation3 + $0x94] ss:$8 sps:$4 sm:$0xff]  }
  0x79   :  { %1854 = vmatprep.subr.bf16.mxu0 %v2158_v17  ;;  %1908 = vmatprep.subr.bf16.mxu1 %v2158_v17 }
  0x7b   :  { %514 = vmatmul.mubr.bf16.vlgmr.msra.gmra.mrb[0].mxu0 %v1961_v18  ;;  %v1990_v18 = vld [vmem:[#allocation3 + $0x90] ss:$8 sps:$4 sm:$0xff]  }
  0x7c   :  { %521 = vmatprep.mubr.bf16.mxu0 %v1964_v19  ;;  %1856 = vmatpush1.bf16.msra.mxu0 %v1855_v23  ;;  %v1991_v19 = vld [vmem:[#allocation3 + $0xa4] ss:$8 sps:$4 sm:$0xff]   ;;  %v836_v23 = vld [vmem:[#allocation11 + $0xf8] sm:$0xff] }
  0x7d   :  { %1857 = vmatprep.subr.bf16.mxu0 %v2158_v17  ;;  %1924 = vmatpush1.bf16.msra.mxu1 %v1873_v46 }
  0x7e   :  { %1909 = vmatprep.subr.bf16.mxu1 %v2158_v17 }
  0x80   :  { %1859 = vmatpush1.bf16.msra.mxu0 %v1858_v27  ;;  %v2000_v27 = vld [vmem:[#allocation3 + $0xd4] ss:$8 sps:$4 sm:$0xff]  }
  0x81   :  { %1860 = vmatprep.subr.bf16.mxu0 %v2158_v17  ;;  %1925 = vmatpush1.bf16.msra.mxu1 %v1876_v51 }
  0x82   :  { %1910 = vmatprep.subr.bf16.mxu1 %v2158_v17 }
  0x83   :  { %522 = vmatmul.mubr.bf16.gmra.mrb[4].mxu0 %v1966_v22  ;;  %v835_v22 = vld [vmem:[#allocation11 + $0xf0] sm:$0xff] }
  0x84   :  { %529 = vmatprep.mubr.bf16.mxu0 %v1967_v26  ;;  %1862 = vmatpush1.bf16.msra.mxu0 %v1861_v30  ;;  %v1900_v24 = vpack.c.bf16 %v836_v23, %v835_v22  ;;  %v1997_v26 = vld [vmem:[#allocation3 + $0xc4] ss:$8 sps:$4 sm:$0xff]   ;;  %v1499_v30 = vunpack.c.l.bf16 %v1698_v28  ;;  %v1702_v22 = vld [vmem:[#allocation8 + $0x30] sm:$0xff]  }
  0x85   :  { %1863 = vmatprep.subr.bf16.mxu0 %v2158_v17  ;;  %1926 = vmatpush1.bf16.msra.mxu1 %v1879_v54 }
  0x86   :  { %1911 = vmatprep.subr.bf16.mxu1 %v2158_v17  ;;  %928 = vmatprep.mubr.f32.mxu1 %v1499_v30  ;;  %v1703_v30 = vld [vmem:[#allocation8 + $0x38] sm:$0xff]  }
  0x88   :  { %1865 = vmatpush1.bf16.msra.mxu0 %v1864_v35  ;;  %v2008_v35 = vld [vmem:[#allocation3 + $0xf0] ss:$8 sps:$4 sm:$0xff]  }
  0x89   :  { %1866 = vmatprep.subr.bf16.mxu0 %v2158_v17  ;;  %1927 = vmatpush1.bf16.msra.mxu1 %v1882_v59 }
  0x8a   :  { %1912 = vmatprep.subr.bf16.mxu1 %v2158_v17 }
  0x8b   :  { %530 = vmatmul.mubr.bf16.gmra.mrb[8].mxu0 %v1969_v33  ;;  %v2006_v33 = vld [vmem:[#allocation3 + $0xf4] ss:$8 sps:$4 sm:$0xff]  }
  0x8c   :  { %537 = vmatprep.mubr.bf16.mxu0 %v1970_v34  ;;  %1868 = vmatpush1.bf16.msra.mxu0 %v1867_v38  ;;  %v1490_v34 = vld [vmem:[#allocation8] sm:$0xff]  }
  0x8d   :  { %1869 = vmatprep.subr.bf16.mxu0 %v2158_v17  ;;  %1928 = vmatpush1.bf16.msra.mxu1 %v1885_v62  ;;  %v1491_v36 = vunpack.c.l.bf16 %v1490_v34  ;;  %v1492_v39 = vunpack.c.h.bf16 %v1490_v34 }
  0x8e   :  { %1913 = vmatprep.subr.bf16.mxu1 %v2158_v17 }
  0x90   :  { %1871 = vmatpush1.bf16.msra.mxu0 %v1870_v43 }
  0x91   :  { %1872 = vmatprep.subr.bf16.mxu0 %v2158_v17  ;;  %1929 = vmatpush1.bf16.msra.mxu1 %v1888_v3 }
  0x92   :  { %1914 = vmatprep.subr.bf16.mxu1 %v2158_v17 }
  0x93   :  { %538 = vmatmul.mubr.bf16.gmra.mrb[12].mxu0 %v1972_v41 }
  0x94   :  { %545 = vmatprep.mubr.bf16.mxu0 %v1973_v42  ;;  %1874 = vmatpush1.bf16.msra.mxu0 %v1873_v46  ;;  %v1697_v42 = vld [vmem:[#allocation8 + $0x8] sm:$0xff]  }
  0x95   :  { %1875 = vmatprep.subr.bf16.mxu0 %v2158_v17  ;;  %1930 = vmatpush1.bf16.msra.mxu1 %v1891_v6  ;;  %v1495_v45 = vunpack.c.l.bf16 %v1697_v42  ;;  %v1496_v48 = vunpack.c.h.bf16 %v1697_v42 }
  0x96   :  { %1915 = vmatprep.subr.bf16.mxu1 %v2158_v17 }
  0x98   :  { %1877 = vmatpush1.bf16.msra.mxu0 %v1876_v51 }
  0x99   :  { %1878 = vmatprep.subr.bf16.mxu0 %v2158_v17  ;;  %1931 = vmatpush1.bf16.msra.mxu1 %v1894_v11 }
  0x9a   :  { %1916 = vmatprep.subr.bf16.mxu1 %v2158_v17 }
  0x9b   :  { %546 = vmatmul.mubr.bf16.gmra.mrb[16].mxu0 %v1975_v49 }
  0x9c   :  { %553 = vmatprep.mubr.bf16.mxu0 %v1976_v50  ;;  %1880 = vmatpush1.bf16.msra.mxu0 %v1879_v54 }
  0x9d   :  { %1881 = vmatprep.subr.bf16.mxu0 %v2158_v17  ;;  %1932 = vmatpush1.bf16.msra.mxu1 %v1897_v14 }
  0x9e   :  { %1917 = vmatprep.subr.bf16.mxu1 %v2158_v17 }
  0xa0   :  { %1883 = vmatpush1.bf16.msra.mxu0 %v1882_v59 }
  0xa1   :  { %1884 = vmatprep.subr.bf16.mxu0 %v2158_v17  ;;  %1933 = vmatpush1.bf16.msra.mxu1 %v1900_v24 }
  0xa3   :  { %554 = vmatmul.mubr.bf16.gmra.mrb[20].mxu0 %v1978_v57 }
  0xa4   :  { %561 = vmatprep.mubr.bf16.mxu0 %v1979_v58  ;;  %1886 = vmatpush1.bf16.msra.mxu0 %v1885_v62  ;;  %v1699_v58 = vld [vmem:[#allocation8 + $0x18] sm:$0xff]  }
  0xa5   :  { %1887 = vmatprep.subr.bf16.mxu0 %v2158_v17  ;;  %v1503_v61 = vunpack.c.l.bf16 %v1699_v58  ;;  %v1504_v0 = vunpack.c.h.bf16 %v1699_v58 }
  0xa8   :  { %1889 = vmatpush1.bf16.msra.mxu0 %v1888_v3  ;;  %v1700_v3 = vld [vmem:[#allocation8 + $0x20] sm:$0xff]  }
  0xa9   :  { %1890 = vmatprep.subr.bf16.mxu0 %v2158_v17 }
  0xab   :  { %562 = vmatmul.mubr.bf16.gmra.mrb[24].mxu0 %v1981_v1 }
  0xac   :  { %569 = vmatprep.mubr.bf16.mxu0 %v1982_v2  ;;  %1892 = vmatpush1.bf16.msra.mxu0 %v1891_v6  ;;  %v1507_v6 = vunpack.c.l.bf16 %v1700_v3 }
  0xad   :  { %1893 = vmatprep.subr.bf16.mxu0 %v2158_v17 }
  0xb0   :  { %1895 = vmatpush1.bf16.msra.mxu0 %v1894_v11 }
  0xb1   :  { %1896 = vmatprep.subr.bf16.mxu0 %v2158_v17 }
  0xb3   :  { %570 = vmatmul.mubr.bf16.gmra.mrb[28].mxu0 %v1984_v9  ;;  %v1508_v9 = vunpack.c.h.bf16 %v1700_v3 }
  0xb4   :  { %577 = vmatprep.mubr.bf16.mxu0 %v1985_v10  ;;  %1898 = vmatpush1.bf16.msra.mxu0 %v1897_v14 }
  0xb5   :  { %1899 = vmatprep.subr.bf16.mxu0 %v2158_v17  ;;  %v1999_v17 = vld [vmem:[#allocation3 + $0xc0] ss:$8 sps:$4 sm:$0xff]  }
  0xb8   :  { %1901 = vmatpush1.bf16.msra.mxu0 %v1900_v24 }
  0xbb   :  { %578 = vmatmul.mubr.bf16.gmra.mrb[32].mxu0 %v1987_v15  ;;  %v1511_v15 = vunpack.c.l.bf16 %v1701_v12 }
  0xbc   :  { %585 = vmatprep.mubr.bf16.mxu0 %v1988_v16 }
  0xc3   :  { %586 = vmatmul.mubr.bf16.gmra.mrb[36].mxu0 %v1990_v18 }
  0xc4   :  { %593 = vmatprep.mubr.bf16.mxu0 %v1991_v19  ;;  %v1512_v19 = vunpack.c.h.bf16 %v1701_v12 }
  0xcb   :  { %594 = vmatmul.mubr.bf16.gmra.mrb[40].mxu0 %v1993_v20 }
  0xcc   :  { %601 = vmatprep.mubr.bf16.mxu0 %v1994_v21 }
  0xd3   :  { %602 = vmatmul.mubr.bf16.gmra.mrb[44].mxu0 %v1996_v25  ;;  %v1515_v25 = vunpack.c.l.bf16 %v1702_v22 }
  0xd4   :  { %609 = vmatprep.mubr.bf16.mxu0 %v1997_v26 }
  0xdb   :  { %610 = vmatmul.mubr.bf16.gmra.mrb[48].mxu0 %v1999_v17 }
  0xdc   :  { %617 = vmatprep.mubr.bf16.mxu0 %v2000_v27  ;;  %v1516_v27 = vunpack.c.h.bf16 %v1702_v22 }
  0xe3   :  { %618 = vmatmul.mubr.bf16.gmra.mrb[52].mxu0 %v2002_v29 }
  0xe4   :  { %625 = vmatprep.mubr.bf16.mxu0 %v2003_v31 }
  0xeb   :  { %626 = vmatmul.mubr.bf16.gmra.mrb[56].mxu0 %v2005_v32 }
  0xec   :  { %633 = vmatprep.mubr.bf16.mxu0 %v2006_v33  ;;  %v1519_v33 = vunpack.c.l.bf16 %v1703_v30 }
  0xf3   :  { %634 = vmatmul.mubr.bf16.gmra.mrb[60].mxu0 %v2008_v35 }
  0xf4   :  { %908 = vmatprep.mubr.f32.mxu0 %v1491_v36  ;;  %v1520_v36 = vunpack.c.h.bf16 %v1703_v30 }
 0x14e   :  { %v1758_v37 = vpop.f32.mrb[0].mxu0 }
 0x14f   :  { %v1759_v38 = vpop.f32.mrb[1].mxu0 }
 0x150   :  { %v1760_v40 = vadd.f32 %v1759_v38, %v1758_v37  ;;  %v1761_v41 = vpop.f32.mrb[2].mxu0 }
 0x151   :  { %v1762_v43 = vpop.f32.mrb[3].mxu0 }
 0x152   :  { %v1763_v44 = vadd.f32 %v1762_v43, %v1761_v41  ;;  %909 = vmatmul.mubr.f32.vlgmr.msra.gmra.mrb[64].mxu0 %v1760_v40 }
 0x153   :  { %913 = vmatprep.mubr.f32.mxu0 %v1492_v39  ;;  %v1704_v39 = vld [vmem:[#allocation8 + $0x40] sm:$0xff]  }
 0x154   :  { %v1523_v42 = vunpack.c.l.bf16 %v1704_v39 }
 0x156   :  { %v1764_v46 = vpop.f32.mrb[4].mxu0  ;;  %914 = vmatmul.mubr.f32.gmra.mrb[66].mxu0 %v1763_v44 }
 0x157   :  { %v1765_v47 = vpop.f32.mrb[5].mxu0  ;;  %918 = vmatprep.mubr.f32.mxu0 %v1495_v45  ;;  %v1524_v45 = vunpack.c.h.bf16 %v1704_v39 }
 0x158   :  { %v1766_v49 = vadd.f32 %v1765_v47, %v1764_v46  ;;  %v1767_v50 = vpop.f32.mrb[6].mxu0 }
 0x159   :  { %v1768_v51 = vpop.f32.mrb[7].mxu0 }
 0x15a   :  { %v1769_v52 = vadd.f32 %v1768_v51, %v1767_v50  ;;  %919 = vmatmul.mubr.f32.gmra.mrb[68].mxu0 %v1766_v49 }
 0x15b   :  { %923 = vmatprep.mubr.f32.mxu0 %v1496_v48  ;;  %v1705_v48 = vld [vmem:[#allocation8 + $0x48] sm:$0xff]  }
 0x15c   :  { %v1527_v51 = vunpack.c.l.bf16 %v1705_v48 }
 0x15e   :  { %v1770_v53 = vpop.f32.mrb[8].mxu0  ;;  %924 = vmatmul.mubr.f32.gmra.mrb[70].mxu0 %v1769_v52 }
 0x15f   :  { %v1771_v54 = vpop.f32.mrb[9].mxu0 }
 0x160   :  { %v1772_v56 = vadd.f32 %v1771_v54, %v1770_v53  ;;  %v1773_v57 = vpop.f32.mrb[10].mxu0  ;;  %v1528_v54 = vunpack.c.h.bf16 %v1705_v48 }
 0x161   :  { %v1774_v59 = vpop.f32.mrb[11].mxu0 }
 0x162   :  { %v1775_v60 = vadd.f32 %v1774_v59, %v1773_v57  ;;  %929 = vmatmul.mubr.f32.vlgmr.msra.gmra.mrb[0].mxu1 %v1772_v56  ;;  %v1706_v57 = vld [vmem:[#allocation8 + $0x50] sm:$0xff]  }
 0x163   :  { %933 = vmatprep.mubr.f32.mxu1 %v1500_v55 }
 0x166   :  { %v1776_v62 = vpop.f32.mrb[12].mxu0  ;;  %934 = vmatmul.mubr.f32.gmra.mrb[2].mxu1 %v1775_v60  ;;  %v1531_v60 = vunpack.c.l.bf16 %v1706_v57 }
 0x167   :  { %v1777_v63 = vpop.f32.mrb[13].mxu0  ;;  %938 = vmatprep.mubr.f32.mxu1 %v1503_v61 }
 0x168   :  { %v1778_v1 = vadd.f32 %v1777_v63, %v1776_v62  ;;  %v1779_v2 = vpop.f32.mrb[14].mxu0  ;;  %v1532_v63 = vunpack.c.h.bf16 %v1706_v57 }
 0x169   :  { %v1780_v4 = vpop.f32.mrb[15].mxu0 }
 0x16a   :  { %v1781_v5 = vadd.f32 %v1780_v4, %v1779_v2  ;;  %939 = vmatmul.mubr.f32.gmra.mrb[4].mxu1 %v1778_v1  ;;  %v1707_v2 = vld [vmem:[#allocation8 + $0x58] sm:$0xff]  }
 0x16b   :  { %943 = vmatprep.mubr.f32.mxu1 %v1504_v0 }
 0x16e   :  { %v1782_v7 = vpop.f32.mrb[16].mxu0  ;;  %944 = vmatmul.mubr.f32.gmra.mrb[6].mxu1 %v1781_v5  ;;  %v1535_v5 = vunpack.c.l.bf16 %v1707_v2 }
 0x16f   :  { %v1783_v8 = vpop.f32.mrb[17].mxu0  ;;  %948 = vmatprep.mubr.f32.mxu1 %v1507_v6 }
 0x170   :  { %v1784_v10 = vadd.f32 %v1783_v8, %v1782_v7  ;;  %v1785_v11 = vpop.f32.mrb[18].mxu0  ;;  %v1536_v8 = vunpack.c.h.bf16 %v1707_v2  ;;  %v1712_v2 = vld [vmem:[#allocation9 + $0x8] sm:$0xff]  }
 0x171   :  { %v1786_v13 = vpop.f32.mrb[19].mxu0 }
 0x172   :  { %v1787_v14 = vadd.f32 %v1786_v13, %v1785_v11  ;;  %949 = vmatmul.mubr.f32.gmra.mrb[8].mxu1 %v1784_v10  ;;  %v1708_v11 = vld [vmem:[#allocation8 + $0x60] sm:$0xff]  }
 0x173   :  { %953 = vmatprep.mubr.f32.mxu1 %v1508_v9 }
 0x176   :  { %v1788_v16 = vpop.f32.mrb[20].mxu0  ;;  %954 = vmatmul.mubr.f32.gmra.mrb[10].mxu1 %v1787_v14  ;;  %v1539_v14 = vunpack.c.l.bf16 %v1708_v11 }
 0x177   :  { %v1789_v18 = vpop.f32.mrb[21].mxu0  ;;  %958 = vmatprep.mubr.f32.mxu1 %v1511_v15 }
 0x178   :  { %v1790_v20 = vadd.f32 %v1789_v18, %v1788_v16  ;;  %v1791_v21 = vpop.f32.mrb[22].mxu0  ;;  %v1540_v18 = vunpack.c.h.bf16 %v1708_v11 }
 0x179   :  { %v1792_v23 = vpop.f32.mrb[23].mxu0 }
 0x17a   :  { %v1793_v24 = vadd.f32 %v1792_v23, %v1791_v21  ;;  %959 = vmatmul.mubr.f32.gmra.mrb[12].mxu1 %v1790_v20  ;;  %v1709_v21 = vld [vmem:[#allocation8 + $0x68] sm:$0xff]  }
 0x17b   :  { %963 = vmatprep.mubr.f32.mxu1 %v1512_v19 }
 0x17e   :  { %v1794_v26 = vpop.f32.mrb[24].mxu0  ;;  %964 = vmatmul.mubr.f32.gmra.mrb[14].mxu1 %v1793_v24  ;;  %v1543_v24 = vunpack.c.l.bf16 %v1709_v21 }
 0x17f   :  { %v1795_v17 = vpop.f32.mrb[25].mxu0  ;;  %968 = vmatprep.mubr.f32.mxu1 %v1515_v25 }
 0x180   :  { %v1796_v28 = vadd.f32 %v1795_v17, %v1794_v26  ;;  %v1797_v29 = vpop.f32.mrb[26].mxu0  ;;  %v1544_v17 = vunpack.c.h.bf16 %v1709_v21 }
 0x181   :  { %v1798_v31 = vpop.f32.mrb[27].mxu0 }
 0x182   :  { %v1799_v32 = vadd.f32 %v1798_v31, %v1797_v29  ;;  %969 = vmatmul.mubr.f32.gmra.mrb[16].mxu1 %v1796_v28  ;;  %v1710_v29 = vld [vmem:[#allocation8 + $0x70] sm:$0xff]  }
 0x183   :  { %973 = vmatprep.mubr.f32.mxu1 %v1516_v27 }
 0x186   :  { %v1800_v34 = vpop.f32.mrb[28].mxu0  ;;  %974 = vmatmul.mubr.f32.gmra.mrb[18].mxu1 %v1799_v32  ;;  %v1547_v32 = vunpack.c.l.bf16 %v1710_v29 }
 0x187   :  { %v1801_v35 = vpop.f32.mrb[29].mxu0  ;;  %978 = vmatprep.mubr.f32.mxu1 %v1519_v33 }
 0x188   :  { %v1802_v37 = vadd.f32 %v1801_v35, %v1800_v34  ;;  %v1803_v38 = vpop.f32.mrb[30].mxu0  ;;  %v1548_v35 = vunpack.c.h.bf16 %v1710_v29 }
 0x189   :  { %v1804_v40 = vpop.f32.mrb[31].mxu0 }
 0x18a   :  { %v1805_v41 = vadd.f32 %v1804_v40, %v1803_v38  ;;  %979 = vmatmul.mubr.f32.gmra.mrb[20].mxu1 %v1802_v37  ;;  %v1711_v38 = vld [vmem:[#allocation8 + $0x78] sm:$0xff]  }
 0x18b   :  { %983 = vmatprep.mubr.f32.mxu1 %v1520_v36 }
 0x18e   :  { %v1806_v43 = vpop.f32.mrb[32].mxu0  ;;  %984 = vmatmul.mubr.f32.gmra.mrb[22].mxu1 %v1805_v41  ;;  %v1551_v41 = vunpack.c.l.bf16 %v1711_v38 }
 0x18f   :  { %v1807_v44 = vpop.f32.mrb[33].mxu0  ;;  %988 = vmatprep.mubr.f32.mxu1 %v1523_v42 }
 0x190   :  { %v1808_v46 = vadd.f32 %v1807_v44, %v1806_v43  ;;  %v1809_v47 = vpop.f32.mrb[34].mxu0  ;;  %v1552_v44 = vunpack.c.h.bf16 %v1711_v38 }
 0x191   :  { %v1810_v49 = vpop.f32.mrb[35].mxu0 }
 0x192   :  { %v1811_v50 = vadd.f32 %v1810_v49, %v1809_v47  ;;  %989 = vmatmul.mubr.f32.gmra.mrb[24].mxu1 %v1808_v46  ;;  %v2305_v49 = vld [vmem:[%s2359_s5] ss:$0 sm:$0xff]  ;;  %s2159_s5 = smov [#allocation12]  }
 0x193   :  { %993 = vmatprep.mubr.f32.mxu1 %v1524_v45  ;;  %s1362_s10 = sshll.u32 %s2159_s5, 4  ;;  %s1363_s10 = int_to_ptr.vmem [resolvable:$true] %s1362_s10 }
 0x194   :  { %s2119_s13 = scalar_lea.vmem %s1363_s10, 2048  ;;  %p2124_p13 = scmp.lt.s32.totalorder %s1363_s10, %s1363_s10 }
 0x195   :  { %p2120_p12 = scmp.ne.s32.totalorder %s1363_s10, %s2119_s13  ;;  %p2125_p0 = scmp.lt.s32.totalorder %s2119_s13, %s2119_s13 }
 0x196   :  { %v1812_v52 = vpop.f32.mrb[36].mxu0  ;;  %994 = vmatmul.mubr.f32.gmra.mrb[26].mxu1 %v1811_v50 }
 0x197   :  { %v1813_v53 = vpop.f32.mrb[37].mxu0  ;;  %998 = vmatprep.mubr.f32.mxu1 %v1527_v51  ;;  %p2126_p1 = por %p2125_p0, %p2124_p13 }
 0x198   :  { %v1814_v55 = vadd.f32 %v1813_v53, %v1812_v52  ;;  %v1815_v56 = vpop.f32.mrb[38].mxu0  ;;  %v1554_v53 = vld [vmem:[#allocation9] sm:$0xff]  }
 0x199   :  { %v1816_v58 = vpop.f32.mrb[39].mxu0  ;;  %p2127_p2 = pnand %p2126_p1, %p2120_p12 }
 0x19a   :  { %v1817_v59 = vadd.f32 %v1816_v58, %v1815_v56  ;;  %999 = vmatmul.mubr.f32.gmra.mrb[28].mxu1 %v1814_v55  ;;  %v1555_v56 = vunpack.c.l.bf16 %v1554_v53  ;;  %v1556_v58 = vunpack.c.h.bf16 %v1554_v53 }
 0x19b   :  { %1003 = vmatprep.mubr.f32.mxu1 %v1528_v54 }
 0x19e   :  { %v1818_v61 = vpop.f32.mrb[40].mxu0  ;;  %1004 = vmatmul.mubr.f32.gmra.mrb[30].mxu1 %v1817_v59 }
 0x19f   :  { %v1819_v62 = vpop.f32.mrb[41].mxu0  ;;  %1008 = vmatprep.mubr.f32.mxu1 %v1531_v60 }
 0x1a0   :  { %v1820_v0 = vadd.f32 %v1819_v62, %v1818_v61  ;;  %v1821_v1 = vpop.f32.mrb[42].mxu0 }
 0x1a1   :  { %v1822_v3 = vpop.f32.mrb[43].mxu0 }
 0x1a2   :  { %v1823_v4 = vadd.f32 %v1822_v3, %v1821_v1  ;;  %1009 = vmatmul.mubr.f32.gmra.mrb[32].mxu1 %v1820_v0 }
 0x1a3   :  { %1013 = vmatprep.mubr.f32.mxu1 %v1532_v63 }
 0x1a6   :  { %v1824_v6 = vpop.f32.mrb[44].mxu0  ;;  %1014 = vmatmul.mubr.f32.gmra.mrb[34].mxu1 %v1823_v4 }
 0x1a7   :  { %v1825_v7 = vpop.f32.mrb[45].mxu0  ;;  %1018 = vmatprep.mubr.f32.mxu1 %v1535_v5 }
 0x1a8   :  { %v1826_v9 = vadd.f32 %v1825_v7, %v1824_v6  ;;  %v1827_v10 = vpop.f32.mrb[46].mxu0  ;;  %v1559_v6 = vunpack.c.l.bf16 %v1712_v2 }
 0x1a9   :  { %v1828_v12 = vpop.f32.mrb[47].mxu0 }
 0x1aa   :  { %v1829_v13 = vadd.f32 %v1828_v12, %v1827_v10  ;;  %1019 = vmatmul.mubr.f32.gmra.mrb[36].mxu1 %v1826_v9 }
 0x1ab   :  { %1023 = vmatprep.mubr.f32.mxu1 %v1536_v8  ;;  %v1560_v8 = vunpack.c.h.bf16 %v1712_v2 }
 0x1ae   :  { %v1830_v15 = vpop.f32.mrb[48].mxu0  ;;  %1024 = vmatmul.mubr.f32.gmra.mrb[38].mxu1 %v1829_v13 }
 0x1af   :  { %v1831_v16 = vpop.f32.mrb[49].mxu0  ;;  %1028 = vmatprep.mubr.f32.mxu1 %v1539_v14 }
 0x1b0   :  { %v1832_v19 = vadd.f32 %v1831_v16, %v1830_v15  ;;  %v1833_v20 = vpop.f32.mrb[50].mxu0  ;;  %v1713_v16 = vld [vmem:[#allocation9 + $0x10] sm:$0xff]  }
 0x1b1   :  { %v1834_v22 = vpop.f32.mrb[51].mxu0  ;;  %v1563_v21 = vunpack.c.l.bf16 %v1713_v16 }
 0x1b2   :  { %v1835_v23 = vadd.f32 %v1834_v22, %v1833_v20  ;;  %1029 = vmatmul.mubr.f32.gmra.mrb[40].mxu1 %v1832_v19 }
 0x1b3   :  { %1033 = vmatprep.mubr.f32.mxu1 %v1540_v18 }
 0x1b6   :  { %v1836_v25 = vpop.f32.mrb[52].mxu0  ;;  %1034 = vmatmul.mubr.f32.gmra.mrb[42].mxu1 %v1835_v23  ;;  %v1564_v23 = vunpack.c.h.bf16 %v1713_v16 }
 0x1b7   :  { %v1837_v26 = vpop.f32.mrb[53].mxu0  ;;  %1038 = vmatprep.mubr.f32.mxu1 %v1543_v24 }
 0x1b8   :  { %v1838_v27 = vadd.f32 %v1837_v26, %v1836_v25  ;;  %v1839_v28 = vpop.f32.mrb[54].mxu0 }
 0x1b9   :  { %v1840_v30 = vpop.f32.mrb[55].mxu0 }
 0x1ba   :  { %v1841_v31 = vadd.f32 %v1840_v30, %v1839_v28  ;;  %1039 = vmatmul.mubr.f32.gmra.mrb[44].mxu1 %v1838_v27  ;;  %v1714_v30 = vld [vmem:[#allocation9 + $0x18] sm:$0xff]  }
 0x1bb   :  { %1043 = vmatprep.mubr.f32.mxu1 %v1544_v17 }
 0x1be   :  { %v1842_v33 = vpop.f32.mrb[56].mxu0  ;;  %1044 = vmatmul.mubr.f32.gmra.mrb[46].mxu1 %v1841_v31 }
 0x1bf   :  { %v1843_v34 = vpop.f32.mrb[57].mxu0  ;;  %1048 = vmatprep.mubr.f32.mxu1 %v1547_v32 }
 0x1c0   :  { %v1844_v36 = vadd.f32 %v1843_v34, %v1842_v33  ;;  %v1845_v37 = vpop.f32.mrb[58].mxu0  ;;  %v1567_v34 = vunpack.c.l.bf16 %v1714_v30 }
 0x1c1   :  { %v1846_v39 = vpop.f32.mrb[59].mxu0 }
 0x1c2   :  { %v1847_v40 = vadd.f32 %v1846_v39, %v1845_v37  ;;  %1049 = vmatmul.mubr.f32.gmra.mrb[48].mxu1 %v1844_v36  ;;  %v1568_v36 = vunpack.c.h.bf16 %v1714_v30 }
 0x1c3   :  { %1053 = vmatprep.mubr.f32.mxu1 %v1548_v35 }
 0x1c6   :  { %v1848_v42 = vpop.f32.mrb[60].mxu0  ;;  %1054 = vmatmul.mubr.f32.gmra.mrb[50].mxu1 %v1847_v40 }
 0x1c7   :  { %v1849_v43 = vpop.f32.mrb[61].mxu0  ;;  %1058 = vmatprep.mubr.f32.mxu1 %v1551_v41 }
 0x1c8   :  { %v1850_v45 = vadd.f32 %v1849_v43, %v1848_v42  ;;  %v1851_v46 = vpop.f32.mrb[62].mxu0 }
 0x1c9   :  { %v1852_v47 = vpop.f32.mrb[63].mxu0 }
 0x1ca   :  { %v1853_v48 = vadd.f32 %v1852_v47, %v1851_v46  ;;  %1059 = vmatmul.mubr.f32.gmra.mrb[52].mxu1 %v1850_v45 }
 0x1cb   :  { %1063 = vmatprep.mubr.f32.mxu1 %v1552_v44  ;;  %v1715_v44 = vld [vmem:[#allocation9 + $0x20] sm:$0xff]  }
 0x1ce   :  { %1064 = vmatmul.mubr.f32.gmra.mrb[54].mxu1 %v1853_v48  ;;  %v1571_v48 = vunpack.c.l.bf16 %v1715_v44 }
 0x225   :  { %v910_v50 = vpop.f32.mrb[64].mxu0 }
 0x226   :  { %v911_v51 = vadd.f32 %v2305_v49, %v910_v50  ;;  %v912_v52 = vpop.f32.mrb[65].mxu0 }
 0x228   :  { %v1069_v55 = vmax.f32 %v911_v51, 0.0  ;;  %v1572_v51 = vunpack.c.h.bf16 %v1715_v44 }
 0x229   :  { %v915_v54 = vpop.f32.mrb[66].mxu0 }
 0x22a   :  { %v916_v57 = vadd.f32 %v2305_v49, %v915_v54  ;;  %v917_v59 = vpop.f32.mrb[67].mxu0  ;;  %v1165_v62 = vmul.f32 %v1555_v56, %v1069_v55 }
 0x22b   :  { %v1716_v59 = vld [vmem:[#allocation9 + $0x28] sm:$0xff]  }
 0x22c   :  { %v1070_v60 = vmax.f32 %v916_v57, 0.0 }
 0x22d   :  { %v920_v61 = vpop.f32.mrb[68].mxu0 }
 0x22e   :  { %v1166_v63 = vmul.f32 %v1556_v58, %v1070_v60  ;;  %v921_v0 = vadd.f32 %v2305_v49, %v920_v61  ;;  %v922_v1 = vpop.f32.mrb[69].mxu0 }
 0x22f   :  { %v1576_v1 = vunpack.c.h.bf16 %v1716_v59 }
 0x230   :  { %v1620_v3 = vpack.c.bf16 %v1166_v63, %v1165_v62  ;;  %v1071_v5 = vmax.f32 %v921_v0, 0.0  ;;  %v1575_v63 = vunpack.c.l.bf16 %v1716_v59 }
 0x231   :  { %v925_v4 = vpop.f32.mrb[70].mxu0 }
 0x232   :  { %1621 = vst [vmem:[#allocation12] sm:$0xff] %v1620_v3   ;;  %v926_v7 = vadd.f32 %v2305_v49, %v925_v4  ;;  %v927_v9 = vpop.f32.mrb[71].mxu0  ;;  %v1167_v12 = vmul.f32 %v1559_v6, %v1071_v5 }
 0x233   :  { %v1717_v9 = vld [vmem:[#allocation9 + $0x30] sm:$0xff]  }
 0x234   :  { %v1072_v10 = vmax.f32 %v926_v7, 0.0 }
 0x235   :  { %v930_v11 = vpop.f32.mrb[0].mxu1 }
 0x236   :  { %v1168_v13 = vmul.f32 %v1560_v8, %v1072_v10  ;;  %v931_v14 = vadd.f32 %v2305_v49, %v930_v11  ;;  %v932_v15 = vpop.f32.mrb[1].mxu1 }
 0x237   :  { %v1580_v15 = vunpack.c.h.bf16 %v1717_v9 }
 0x238   :  { %v1625_v18 = vpack.c.bf16 %v1168_v13, %v1167_v12  ;;  %v1073_v20 = vmax.f32 %v931_v14, 0.0  ;;  %v1579_v13 = vunpack.c.l.bf16 %v1717_v9 }
 0x239   :  { %v935_v19 = vpop.f32.mrb[2].mxu1 }
 0x23a   :  { %1727 = vst [vmem:[#allocation12 + $0x8] sm:$0xff] %v1625_v18   ;;  %v936_v22 = vadd.f32 %v2305_v49, %v935_v19  ;;  %v937_v24 = vpop.f32.mrb[3].mxu1  ;;  %v1169_v17 = vmul.f32 %v1563_v21, %v1073_v20 }
 0x23b   :  { %v1718_v24 = vld [vmem:[#allocation9 + $0x38] sm:$0xff]  }
 0x23c   :  { %v1074_v25 = vmax.f32 %v936_v22, 0.0 }
 0x23d   :  { %v940_v26 = vpop.f32.mrb[4].mxu1 }
 0x23e   :  { %v1170_v27 = vmul.f32 %v1564_v23, %v1074_v25  ;;  %v941_v28 = vadd.f32 %v2305_v49, %v940_v26  ;;  %v942_v29 = vpop.f32.mrb[5].mxu1 }
 0x23f   :  { %v1584_v29 = vunpack.c.h.bf16 %v1718_v24 }
 0x240   :  { %v1630_v31 = vpack.c.bf16 %v1170_v27, %v1169_v17  ;;  %v1075_v33 = vmax.f32 %v941_v28, 0.0  ;;  %v1583_v27 = vunpack.c.l.bf16 %v1718_v24 }
 0x241   :  { %v945_v32 = vpop.f32.mrb[6].mxu1 }
 0x242   :  { %1728 = vst [vmem:[#allocation12 + $0x10] sm:$0xff] %v1630_v31   ;;  %v946_v35 = vadd.f32 %v2305_v49, %v945_v32  ;;  %v947_v37 = vpop.f32.mrb[7].mxu1  ;;  %v1171_v40 = vmul.f32 %v1567_v34, %v1075_v33 }
 0x243   :  { %v1719_v37 = vld [vmem:[#allocation9 + $0x40] sm:$0xff]  }
 0x244   :  { %v1076_v38 = vmax.f32 %v946_v35, 0.0 }
 0x245   :  { %v950_v39 = vpop.f32.mrb[8].mxu1 }
 0x246   :  { %v1172_v41 = vmul.f32 %v1568_v36, %v1076_v38  ;;  %v951_v42 = vadd.f32 %v2305_v49, %v950_v39  ;;  %v952_v43 = vpop.f32.mrb[9].mxu1 }
 0x247   :  { %v1588_v43 = vunpack.c.h.bf16 %v1719_v37 }
 0x248   :  { %v1635_v45 = vpack.c.bf16 %v1172_v41, %v1171_v40  ;;  %v1077_v47 = vmax.f32 %v951_v42, 0.0  ;;  %v1587_v41 = vunpack.c.l.bf16 %v1719_v37 }
 0x249   :  { %v955_v46 = vpop.f32.mrb[10].mxu1 }
 0x24a   :  { %1729 = vst [vmem:[#allocation12 + $0x18] sm:$0xff] %v1635_v45   ;;  %v956_v50 = vadd.f32 %v2305_v49, %v955_v46  ;;  %v957_v52 = vpop.f32.mrb[11].mxu1  ;;  %v1173_v55 = vmul.f32 %v1571_v48, %v1077_v47 }
 0x24b   :  { %v1720_v52 = vld [vmem:[#allocation9 + $0x48] sm:$0xff]  }
 0x24c   :  { %v1078_v53 = vmax.f32 %v956_v50, 0.0 }
 0x24d   :  { %v960_v54 = vpop.f32.mrb[12].mxu1 }
 0x24e   :  { %v1174_v56 = vmul.f32 %v1572_v51, %v1078_v53  ;;  %v961_v57 = vadd.f32 %v2305_v49, %v960_v54  ;;  %v962_v58 = vpop.f32.mrb[13].mxu1 }
 0x24f   :  { %v1592_v58 = vunpack.c.h.bf16 %v1720_v52 }
 0x250   :  { %v1640_v60 = vpack.c.bf16 %v1174_v56, %v1173_v55  ;;  %v1079_v62 = vmax.f32 %v961_v57, 0.0  ;;  %v1591_v56 = vunpack.c.l.bf16 %v1720_v52 }
 0x251   :  { %v965_v61 = vpop.f32.mrb[14].mxu1 }
 0x252   :  { %1730 = vst [vmem:[#allocation12 + $0x20] sm:$0xff] %v1640_v60   ;;  %v966_v0 = vadd.f32 %v2305_v49, %v965_v61  ;;  %v967_v2 = vpop.f32.mrb[15].mxu1  ;;  %v1175_v5 = vmul.f32 %v1575_v63, %v1079_v62 }
 0x253   :  { %v1721_v2 = vld [vmem:[#allocation9 + $0x50] sm:$0xff]  }
 0x254   :  { %v1080_v3 = vmax.f32 %v966_v0, 0.0 }
 0x255   :  { %v970_v4 = vpop.f32.mrb[16].mxu1 }
 0x256   :  { %v1176_v6 = vmul.f32 %v1576_v1, %v1080_v3  ;;  %v971_v7 = vadd.f32 %v2305_v49, %v970_v4  ;;  %v972_v8 = vpop.f32.mrb[17].mxu1 }
 0x257   :  { %v1596_v8 = vunpack.c.h.bf16 %v1721_v2 }
 0x258   :  { %v1645_v10 = vpack.c.bf16 %v1176_v6, %v1175_v5  ;;  %v1081_v12 = vmax.f32 %v971_v7, 0.0  ;;  %v1595_v6 = vunpack.c.l.bf16 %v1721_v2 }
 0x259   :  { %v975_v11 = vpop.f32.mrb[18].mxu1 }
 0x25a   :  { %1731 = vst [vmem:[#allocation12 + $0x28] sm:$0xff] %v1645_v10   ;;  %v976_v14 = vadd.f32 %v2305_v49, %v975_v11  ;;  %v977_v16 = vpop.f32.mrb[19].mxu1  ;;  %v1177_v20 = vmul.f32 %v1579_v13, %v1081_v12 }
 0x25b   :  { %v1722_v16 = vld [vmem:[#allocation9 + $0x58] sm:$0xff]  }
 0x25c   :  { %v1082_v18 = vmax.f32 %v976_v14, 0.0 }
 0x25d   :  { %v980_v19 = vpop.f32.mrb[20].mxu1 }
 0x25e   :  { %v1178_v21 = vmul.f32 %v1580_v15, %v1082_v18  ;;  %v981_v22 = vadd.f32 %v2305_v49, %v980_v19  ;;  %v982_v23 = vpop.f32.mrb[21].mxu1 }
 0x25f   :  { %v1600_v23 = vunpack.c.h.bf16 %v1722_v16 }
 0x260   :  { %v1650_v25 = vpack.c.bf16 %v1178_v21, %v1177_v20  ;;  %v1083_v17 = vmax.f32 %v981_v22, 0.0  ;;  %v1599_v21 = vunpack.c.l.bf16 %v1722_v16 }
 0x261   :  { %v985_v26 = vpop.f32.mrb[22].mxu1 }
 0x262   :  { %1732 = vst [vmem:[#allocation12 + $0x30] sm:$0xff] %v1650_v25   ;;  %v986_v28 = vadd.f32 %v2305_v49, %v985_v26  ;;  %v987_v30 = vpop.f32.mrb[23].mxu1  ;;  %v1179_v33 = vmul.f32 %v1583_v27, %v1083_v17 }
 0x263   :  { %v1723_v30 = vld [vmem:[#allocation9 + $0x60] sm:$0xff]  }
 0x264   :  { %v1084_v31 = vmax.f32 %v986_v28, 0.0 }
 0x265   :  { %v990_v32 = vpop.f32.mrb[24].mxu1 }
 0x266   :  { %v1180_v34 = vmul.f32 %v1584_v29, %v1084_v31  ;;  %v991_v35 = vadd.f32 %v2305_v49, %v990_v32  ;;  %v992_v36 = vpop.f32.mrb[25].mxu1 }
 0x267   :  { %v1604_v36 = vunpack.c.h.bf16 %v1723_v30 }
 0x268   :  { %v1655_v38 = vpack.c.bf16 %v1180_v34, %v1179_v33  ;;  %v1085_v40 = vmax.f32 %v991_v35, 0.0  ;;  %v1603_v34 = vunpack.c.l.bf16 %v1723_v30 }
 0x269   :  { %v995_v39 = vpop.f32.mrb[26].mxu1 }
 0x26a   :  { %1733 = vst [vmem:[#allocation12 + $0x38] sm:$0xff] %v1655_v38   ;;  %v996_v42 = vadd.f32 %v2305_v49, %v995_v39  ;;  %v997_v44 = vpop.f32.mrb[27].mxu1  ;;  %v1181_v47 = vmul.f32 %v1587_v41, %v1085_v40 }
 0x26b   :  { %v1724_v44 = vld [vmem:[#allocation9 + $0x68] sm:$0xff]  }
 0x26c   :  { %v1086_v45 = vmax.f32 %v996_v42, 0.0 }
 0x26d   :  { %v1000_v46 = vpop.f32.mrb[28].mxu1 }
 0x26e   :  { %v1182_v48 = vmul.f32 %v1588_v43, %v1086_v45  ;;  %v1001_v50 = vadd.f32 %v2305_v49, %v1000_v46  ;;  %v1002_v51 = vpop.f32.mrb[29].mxu1 }
 0x26f   :  { %v1608_v51 = vunpack.c.h.bf16 %v1724_v44 }
 0x270   :  { %v1660_v53 = vpack.c.bf16 %v1182_v48, %v1181_v47  ;;  %v1087_v55 = vmax.f32 %v1001_v50, 0.0  ;;  %v1607_v48 = vunpack.c.l.bf16 %v1724_v44 }
 0x271   :  { %v1005_v54 = vpop.f32.mrb[30].mxu1 }
 0x272   :  { %1734 = vst [vmem:[#allocation12 + $0x40] sm:$0xff] %v1660_v53   ;;  %v1006_v57 = vadd.f32 %v2305_v49, %v1005_v54  ;;  %v1007_v59 = vpop.f32.mrb[31].mxu1  ;;  %v1183_v62 = vmul.f32 %v1591_v56, %v1087_v55 }
 0x273   :  { %v1725_v59 = vld [vmem:[#allocation9 + $0x70] sm:$0xff]  }
 0x274   :  { %v1088_v60 = vmax.f32 %v1006_v57, 0.0 }
 0x275   :  { %v1010_v61 = vpop.f32.mrb[32].mxu1 }
 0x276   :  { %v1184_v63 = vmul.f32 %v1592_v58, %v1088_v60  ;;  %v1011_v0 = vadd.f32 %v2305_v49, %v1010_v61  ;;  %v1012_v1 = vpop.f32.mrb[33].mxu1 }
 0x277   :  { %v1612_v1 = vunpack.c.h.bf16 %v1725_v59 }
 0x278   :  { %v1665_v3 = vpack.c.bf16 %v1184_v63, %v1183_v62  ;;  %v1089_v5 = vmax.f32 %v1011_v0, 0.0  ;;  %v1611_v63 = vunpack.c.l.bf16 %v1725_v59 }
 0x279   :  { %v1015_v4 = vpop.f32.mrb[34].mxu1 }
 0x27a   :  { %1735 = vst [vmem:[#allocation12 + $0x48] sm:$0xff] %v1665_v3   ;;  %v1016_v7 = vadd.f32 %v2305_v49, %v1015_v4  ;;  %v1017_v9 = vpop.f32.mrb[35].mxu1  ;;  %v1185_v12 = vmul.f32 %v1595_v6, %v1089_v5 }
 0x27b   :  { %v1726_v9 = vld [vmem:[#allocation9 + $0x78] sm:$0xff]  }
 0x27c   :  { %v1090_v10 = vmax.f32 %v1016_v7, 0.0 }
 0x27d   :  { %v1020_v11 = vpop.f32.mrb[36].mxu1 }
 0x27e   :  { %v1186_v13 = vmul.f32 %v1596_v8, %v1090_v10  ;;  %v1021_v14 = vadd.f32 %v2305_v49, %v1020_v11  ;;  %v1022_v15 = vpop.f32.mrb[37].mxu1 }
 0x27f   :  { %v1616_v15 = vunpack.c.h.bf16 %v1726_v9 }
 0x280   :  { %v1670_v18 = vpack.c.bf16 %v1186_v13, %v1185_v12  ;;  %v1091_v20 = vmax.f32 %v1021_v14, 0.0  ;;  %v1615_v13 = vunpack.c.l.bf16 %v1726_v9 }
 0x281   :  { %v1025_v19 = vpop.f32.mrb[38].mxu1 }
 0x282   :  { %1736 = vst [vmem:[#allocation12 + $0x50] sm:$0xff] %v1670_v18   ;;  %v1026_v22 = vadd.f32 %v2305_v49, %v1025_v19  ;;  %v1027_v24 = vpop.f32.mrb[39].mxu1  ;;  %v1187_v17 = vmul.f32 %v1599_v21, %v1091_v20 }
 0x284   :  { %v1092_v25 = vmax.f32 %v1026_v22, 0.0 }
 0x285   :  { %v1030_v26 = vpop.f32.mrb[40].mxu1 }
 0x286   :  { %v1188_v27 = vmul.f32 %v1600_v23, %v1092_v25  ;;  %v1031_v28 = vadd.f32 %v2305_v49, %v1030_v26  ;;  %v1032_v29 = vpop.f32.mrb[41].mxu1 }
 0x288   :  { %v1675_v31 = vpack.c.bf16 %v1188_v27, %v1187_v17  ;;  %v1093_v33 = vmax.f32 %v1031_v28, 0.0 }
 0x289   :  { %v1035_v32 = vpop.f32.mrb[42].mxu1 }
 0x28a   :  { %1737 = vst [vmem:[#allocation12 + $0x58] sm:$0xff] %v1675_v31   ;;  %v1036_v35 = vadd.f32 %v2305_v49, %v1035_v32  ;;  %v1037_v37 = vpop.f32.mrb[43].mxu1  ;;  %v1189_v40 = vmul.f32 %v1603_v34, %v1093_v33 }
 0x28c   :  { %v1094_v38 = vmax.f32 %v1036_v35, 0.0 }
 0x28d   :  { %v1040_v39 = vpop.f32.mrb[44].mxu1 }
 0x28e   :  { %v1190_v41 = vmul.f32 %v1604_v36, %v1094_v38  ;;  %v1041_v42 = vadd.f32 %v2305_v49, %v1040_v39  ;;  %v1042_v43 = vpop.f32.mrb[45].mxu1 }
 0x290   :  { %v1680_v45 = vpack.c.bf16 %v1190_v41, %v1189_v40  ;;  %v1095_v47 = vmax.f32 %v1041_v42, 0.0 }
 0x291   :  { %v1045_v46 = vpop.f32.mrb[46].mxu1 }
 0x292   :  { %1738 = vst [vmem:[#allocation12 + $0x60] sm:$0xff] %v1680_v45   ;;  %v1046_v50 = vadd.f32 %v2305_v49, %v1045_v46  ;;  %v1047_v52 = vpop.f32.mrb[47].mxu1  ;;  %v1191_v55 = vmul.f32 %v1607_v48, %v1095_v47 }
 0x294   :  { %v1096_v53 = vmax.f32 %v1046_v50, 0.0 }
 0x295   :  { %v1050_v54 = vpop.f32.mrb[48].mxu1 }
 0x296   :  { %v1192_v56 = vmul.f32 %v1608_v51, %v1096_v53  ;;  %v1051_v57 = vadd.f32 %v2305_v49, %v1050_v54  ;;  %v1052_v58 = vpop.f32.mrb[49].mxu1 }
 0x298   :  { %v1685_v60 = vpack.c.bf16 %v1192_v56, %v1191_v55  ;;  %v1097_v62 = vmax.f32 %v1051_v57, 0.0 }
 0x299   :  { %v1055_v61 = vpop.f32.mrb[50].mxu1 }
 0x29a   :  { %1739 = vst [vmem:[#allocation12 + $0x68] sm:$0xff] %v1685_v60   ;;  %v1056_v0 = vadd.f32 %v2305_v49, %v1055_v61  ;;  %v1057_v2 = vpop.f32.mrb[51].mxu1  ;;  %v1193_v5 = vmul.f32 %v1611_v63, %v1097_v62 }
 0x29c   :  { %v1098_v3 = vmax.f32 %v1056_v0, 0.0 }
 0x29d   :  { %v1060_v4 = vpop.f32.mrb[52].mxu1 }
 0x29e   :  { %v1194_v6 = vmul.f32 %v1612_v1, %v1098_v3  ;;  %v1061_v7 = vadd.f32 %v2305_v49, %v1060_v4  ;;  %v1062_v8 = vpop.f32.mrb[53].mxu1 }
 0x2a0   :  { %v1690_v10 = vpack.c.bf16 %v1194_v6, %v1193_v5  ;;  %v1099_v12 = vmax.f32 %v1061_v7, 0.0 }
 0x2a1   :  { %v1065_v11 = vpop.f32.mrb[54].mxu1 }
 0x2a2   :  { %1740 = vst [vmem:[#allocation12 + $0x70] sm:$0xff] %v1690_v10   ;;  %v1066_v14 = vadd.f32 %v2305_v49, %v1065_v11  ;;  %v1067_v16 = vpop.f32.mrb[55].mxu1  ;;  %v1195_v19 = vmul.f32 %v1615_v13, %v1099_v12 }
 0x2a4   :  { %v1100_v18 = vmax.f32 %v1066_v14, 0.0 }
 0x2a6   :  { %v1196_v20 = vmul.f32 %v1616_v15, %v1100_v18 }
 0x2a8   :  { %v1695_v21 = vpack.c.bf16 %v1196_v20, %v1195_v19 }
 0x2aa   :  { %1741 = vst [vmem:[#allocation12 + $0x78] sm:$0xff] %v1695_v21  }
 0x2ab   :  { %2130 = shalt.err (!%p2127_p2)
}
 0x2ac   :  { %s2131_s17 = scalar_lea.hbm %s2360_s6, 2048 }
 0x2ad   :  { %p2132_p3 = scmp.ne.s32.totalorder %s2360_s6, %s2131_s17  ;;  %p2135_p4 = scmp.lt.u32.totalorder %s2131_s17, %s2360_s6 }
 0x2af   :  { %p2137_p5 = pnand %p2135_p4, %p2132_p3 }
 0x2b1   :  { %2140 = shalt.err (!%p2137_p5)
}
 0x2b2   :  { %1368 = dma.vmem_to_hbm [thread:$0]  %s1363_s10, 2048, %s2360_s6, [#allocation5], %s2150_s7, %s2150_s7, %s2151_s8  }
 0x2b3   :  { %2147 = dma.done.wait [#allocation5], 2048  }
 0x2b4   :  { %2148 = vsyncadd [#allocation5], 4294965248 }
 0x2b5   :  { %1372 = vsyncpa [#allocation4], 1 }
 0x2b6   :  { %1373 = vsyncpa [#allocation7], 1 }
 0x2b7   :  { %1374 = vsyncpa [#allocation10], 1 }
 0x2b8   :  { %1375 = vsyncpa [#allocation5], 1 }

</bundles_post_ra>
